<compile_context>
chip_gen: v5e
topology: v5e:2x2
jax: 0.10.0
libtpu: 0.0.40
codegen_flags: <defaults>
</compile_context>

<pallas_src>
import functools
from typing import NamedTuple

import jax
import jax.numpy as jnp
from jax import lax
from jax.experimental import pallas as pl
from jax.experimental.pallas import tpu as pltpu


def _round_up(x, m):
    return (x + m - 1) // m * m


def _device_vmem_bytes():
    """Per-core VMEM capacity; conservative 64 MiB fallback (v7x floor / interpret)."""
    try:
        info = pltpu.get_tpu_info()
        cap = int(getattr(info, "vmem_capacity_bytes", 0))
        if cap > 0:
            return cap
    except Exception:
        pass
    return 64 * 2**20


# ----------------------------------------------------------------------------
# Kernels
# ----------------------------------------------------------------------------
def _mlp_eval_kernel(x_ref, w1_ref, b1_ref, w2_ref, b2_ref, o_ref, acc_ref):
    k = pl.program_id(1)
    nk = pl.num_programs(1)

    @pl.when(k == 0)
    def _():
        acc_ref[...] = jnp.zeros_like(acc_ref)

    # h_blk = relu(x_tile @ W1[:, ff_blk] + b1[ff_blk])   (f32 MXU accumulation)
    h = jnp.dot(x_ref[...], w1_ref[...], preferred_element_type=jnp.float32)
    h = jnp.maximum(h + b1_ref[...], 0.0)

    partial = jnp.dot(h.astype(w2_ref.dtype), w2_ref[...],
                      preferred_element_type=jnp.float32)

    @pl.when(k < nk - 1)
    def _():
        acc_ref[...] += partial

    # Fused epilogue: no acc store+reload on the final reduction step.
    @pl.when(k == nk - 1)
    def _():
        o_ref[...] = (acc_ref[...] + partial + b2_ref[...]).astype(o_ref.dtype)


def _mlp_train_kernel(seed_ref, x_ref, w1_ref, b1_ref, w2_ref, b2_ref,
                      o_ref, acc_ref, *, drop_threshold, inv_keep, tm, tff):
    i = pl.program_id(0)
    k = pl.program_id(1)
    nk = pl.num_programs(1)

    @pl.when(k == 0)
    def _():
        acc_ref[...] = jnp.zeros_like(acc_ref)

    h = jnp.dot(x_ref[...], w1_ref[...], preferred_element_type=jnp.float32)
    h = jnp.maximum(h + b1_ref[...], 0.0)

    # Inverted dropout via a counter-based hash PRNG keyed on
    # (seed, global_row, global_hidden_col): tiling-invariant, portable (no
    # pltpu.prng_*), and adjacent seeds are decorrelated by the finalizer.
    row_u = (lax.broadcasted_iota(jnp.int32, h.shape, 0) + i * tm).astype(jnp.uint32)
    col_u = (lax.broadcasted_iota(jnp.int32, h.shape, 1) + k * tff).astype(jnp.uint32)
    seed_u = seed_ref[0].astype(jnp.uint32)
    hv = (row_u * jnp.uint32(0x9E3779B1)
          + col_u * jnp.uint32(0x85EBCA77)
          + seed_u * jnp.uint32(0xC2B2AE3D))
    hv = hv ^ (hv >> 16)
    hv = hv * jnp.uint32(0x7FEB352D)
    hv = hv ^ (hv >> 15)
    hv = hv * jnp.uint32(0x846CA68B)
    hv = hv ^ (hv >> 16)
    # Drop when hv < drop_threshold  =>  P(keep) = 1 - p.
    h = jnp.where(hv >= jnp.uint32(drop_threshold), h * inv_keep, 0.0)

    partial = jnp.dot(h.astype(w2_ref.dtype), w2_ref[...],
                      preferred_element_type=jnp.float32)

    @pl.when(k < nk - 1)
    def _():
        acc_ref[...] += partial

    @pl.when(k == nk - 1)
    def _():
        o_ref[...] = (acc_ref[...] + partial + b2_ref[...]).astype(o_ref.dtype)


# ----------------------------------------------------------------------------
# Parameter preparation (hoisted out of the per-call path; cache & reuse)
# ----------------------------------------------------------------------------
class PreparedMLPParams(NamedTuple):
    w1_t: jax.Array   # (dm_p, dff_p) bf16 == W1.T (padded)
    b1_p: jax.Array   # (1, dff_p)    f32
    w2_t: jax.Array   # (dff_p, dm_p) bf16 == W2.T (padded)
    b2_p: jax.Array   # (1, dm_p)     f32
    d_model: int
    d_ff: int


def prepare_mlp_params(w1, b1, w2, b2):
    """PyTorch Linear layouts: w1 (d_ff, d_model), w2 (d_model, d_ff)."""
    d_ff, d_model = w1.shape
    dm_p = _round_up(d_model, 128)
    dff_p = _round_up(d_ff, 128)
    w1_t = w1.T.astype(jnp.bfloat16)
    w2_t = w2.T.astype(jnp.bfloat16)
    b1_f = b1.astype(jnp.float32)
    b2_f = b2.astype(jnp.float32)
    if d_model == dm_p and d_ff == dff_p:
        # Fast path: already 128-aligned -> no pad copies.
        b1_p = b1_f.reshape(1, dff_p)
        b2_p = b2_f.reshape(1, dm_p)
    else:
        w1_t = jnp.zeros((dm_p, dff_p), jnp.bfloat16).at[:d_model, :d_ff].set(w1_t)
        w2_t = jnp.zeros((dff_p, dm_p), jnp.bfloat16).at[:d_ff, :d_model].set(w2_t)
        b1_p = jnp.zeros((1, dff_p), jnp.float32).at[0, :d_ff].set(b1_f)
        b2_p = jnp.zeros((1, dm_p), jnp.float32).at[0, :d_model].set(b2_f)
    return PreparedMLPParams(w1_t, b1_p, w2_t, b2_p, int(d_model), int(d_ff))


# ----------------------------------------------------------------------------
# Tile selection (device-VMEM driven)
# ----------------------------------------------------------------------------
def _pick_tiles(n_rows, dm_p, dff_p, out_bytes, vmem_cap):
    # d_ff reduction tile: 512 by default; 256 on small-VMEM chips (v7x) with wide
    # d_model -- shrink the non-matmul dim, keep M (rows) and output-N full.
    target_tff = 256 if (dm_p >= 4096 and vmem_cap <= 80 * 2**20) else 512
    tff = min(target_tff, dff_p)
    while dff_p % tff:
        tff -= 128

    budget = int(vmem_cap * 0.85)
    # Double-buffered W1/W2 slices (bf16) + biases.
    w_bytes = 2 * (dm_p * tff + tff * dm_p) * 2 + 2 * (tff + dm_p) * 4
    # Per-row cost: x tile dbl-buf (bf16) + out dbl-buf + f32 accumulator.
    per_row = dm_p * (2 * 2 + 2 * out_bytes + 4)

    tm = 16
    for cand in (1024, 512, 256, 128, 64, 32, 16):
        if w_bytes + cand * per_row <= budget:
            tm = cand
            break
    tm = min(tm, _round_up(n_rows, 16))
    # Megacore (v7x, 2 TCs): keep >= 2 steps on the "parallel" row axis if possible.
    while tm >= 32 and _round_up(n_rows, tm) // tm < 2:
        tm = _round_up(tm // 2, 16)
    return tm, tff, w_bytes, per_row


# ----------------------------------------------------------------------------
# Forward wrapper
# ----------------------------------------------------------------------------
def mlp_forward(x, params, *, dropout_p=0.1, train=False, seed=0, out_dtype=None):
    """Computes w_2(dropout(relu(w_1(x)))).  `params` is PreparedMLPParams (preferred,
    prepare once and reuse) or a raw (w1, b1, w2, b2) tuple in PyTorch layouts."""
    if not isinstance(params, PreparedMLPParams):
        params = prepare_mlp_params(*params)
    d_model = params.d_model
    assert x.shape[-1] == d_model
    orig_shape = x.shape
    out_dtype = jnp.dtype(out_dtype) if out_dtype is not None else x.dtype
    x2d = x.reshape(-1, d_model)
    n_rows = x2d.shape[0]

    p = float(dropout_p)
    if train and p >= 1.0:
        # Every hidden unit dropped -> output reduces to the second bias.
        b2 = params.b2_p[0, :d_model].astype(out_dtype)
        return jnp.broadcast_to(b2, orig_shape[:-1] + (d_model,))

    dm_p, dff_p = params.w1_t.shape
    out_bytes = jnp.dtype(out_dtype).itemsize
    vmem_cap = _device_vmem_bytes()
    TM, TFF, w_bytes, per_row = _pick_tiles(n_rows, dm_p, dff_p, out_bytes, vmem_cap)
    n_rows_p = _round_up(n_rows, TM)
    grid = (n_rows_p // TM, dff_p // TFF)

    # x prep: fast path (no pad copy) when rows/features are already aligned.
    if n_rows == n_rows_p and d_model == dm_p:
        x_p = x2d.astype(jnp.bfloat16)
    else:
        x_p = jnp.zeros((n_rows_p, dm_p), jnp.bfloat16).at[:n_rows, :d_model].set(
            x2d.astype(jnp.bfloat16))

    in_specs = [
        pl.BlockSpec((TM, dm_p),  lambda i, k, *_: (i, 0)),   # x row tile
        pl.BlockSpec((dm_p, TFF), lambda i, k, *_: (0, k)),   # W1 ff slice (streams)
        pl.BlockSpec((1, TFF),    lambda i, k, *_: (0, k)),   # b1 ff slice
        pl.BlockSpec((TFF, dm_p), lambda i, k, *_: (k, 0)),   # W2 ff slice (streams)
        pl.BlockSpec((1, dm_p),   lambda i, k, *_: (0, 0)),   # b2
    ]
    out_spec = pl.BlockSpec((TM, dm_p), lambda i, k, *_: (i, 0))
    scratch = [pltpu.VMEM((TM, dm_p), jnp.float32)]

    footprint = w_bytes + TM * per_row
    vmem_limit = int(min(max(32 * 2**20, int(1.25 * footprint)),
                         int(vmem_cap * 0.92)))
    compiler_params = pltpu.CompilerParams(
        dimension_semantics=("parallel", "arbitrary"),
        vmem_limit_bytes=vmem_limit)
    out_shape = jax.ShapeDtypeStruct((n_rows_p, dm_p), out_dtype)

    if (not train) or p == 0.0:
        out = pl.pallas_call(
            _mlp_eval_kernel,
            out_shape=out_shape,
            grid_spec=pltpu.PrefetchScalarGridSpec(
                num_scalar_prefetch=0, grid=grid,
                in_specs=in_specs, out_specs=out_spec, scratch_shapes=scratch),
            compiler_params=compiler_params,
        )(x_p, params.w1_t, params.b1_p, params.w2_t, params.b2_p)
    else:
        drop_threshold = min(int(round(p * 4294967296.0)), 4294967295)
        inv_keep = 1.0 / (1.0 - p)
        seed_arr = jnp.asarray([seed], dtype=jnp.int32)
        kernel = functools.partial(_mlp_train_kernel,
                                   drop_threshold=drop_threshold,
                                   inv_keep=inv_keep, tm=TM, tff=TFF)
        out = pl.pallas_call(
            kernel,
            out_shape=out_shape,
            grid_spec=pltpu.PrefetchScalarGridSpec(
                num_scalar_prefetch=1, grid=grid,           # seed -> SMEM
                in_specs=in_specs, out_specs=out_spec, scratch_shapes=scratch),
            compiler_params=compiler_params,
        )(seed_arr, x_p, params.w1_t, params.b1_p, params.w2_t, params.b2_p)

    if n_rows_p != n_rows or dm_p != d_model:
        out = out[:n_rows, :d_model]
    return out.reshape(orig_shape[:-1] + (d_model,))


# ----------------------------------------------------------------------------
# Demo / correctness check
# ----------------------------------------------------------------------------
if __name__ == "__main__":
    batch, seq, d_model, d_ff = 2, 8, 32, 64
    key = jax.random.PRNGKey(0)
    kx, k1, kb1, k2, kb2 = jax.random.split(key, 5)

    x = jax.random.normal(kx, (batch, seq, d_model), dtype=jnp.float32)
    # PyTorch nn.Linear layouts: (out_features, in_features).
    w1 = jax.random.normal(k1, (d_ff, d_model), dtype=jnp.float32) / (d_model ** 0.5)
    b1 = jax.random.normal(kb1, (d_ff,), dtype=jnp.float32) * 0.01
    w2 = jax.random.normal(k2, (d_model, d_ff), dtype=jnp.float32) / (d_ff ** 0.5)
    b2 = jax.random.normal(kb2, (d_model,), dtype=jnp.float32) * 0.01

    # Weight prep hoisted out of the call path: prepare ONCE, reuse below.
    params = prepare_mlp_params(w1, b1, w2, b2)

    # Eval-mode forward (dropout == identity, matching model.eval()).
    out = jax.block_until_ready(mlp_forward(x, params, dropout_p=0.1, train=False))
    assert out.shape == (batch, seq, d_model)

    # Reference with matching bf16-operand / f32-accumulate precision.
    ref_h = jnp.maximum(
        jnp.dot(x.astype(jnp.bfloat16), w1.T.astype(jnp.bfloat16),
                preferred_element_type=jnp.float32) + b1, 0.0)
    ref = jnp.dot(ref_h.astype(jnp.bfloat16), w2.T.astype(jnp.bfloat16),
                  preferred_element_type=jnp.float32) + b2
    assert jnp.allclose(out, ref, atol=1e-3, rtol=1e-3), "mismatch vs reference"

    # Loose sanity check against the full-f32 reference as well.
    ref_f32 = jnp.maximum(x @ w1.T + b1, 0.0) @ w2.T + b2
    assert jnp.allclose(out, ref_f32, atol=5e-2, rtol=5e-2)

    # Train path (in-kernel hash-based dropout): shape / finiteness sanity check.
    out_tr = jax.block_until_ready(
        mlp_forward(x, params, dropout_p=0.5, train=True, seed=123))
    assert out_tr.shape == (batch, seq, d_model)
    assert bool(jnp.all(jnp.isfinite(out_tr)))

    print("KERNEL_OK")
</pallas_src>

<mosaic_0001>
module attributes {stable_mosaic.version = 11 : i64} {
  func.func @_mlp_eval_kernel(%arg0: i32, %arg1: i32, %arg2: memref<16x128xbf16, #tpu.memory_space<vmem>>, %arg3: memref<128x128xbf16, #tpu.memory_space<vmem>>, %arg4: memref<1x128xf32, #tpu.memory_space<vmem>>, %arg5: memref<128x128xbf16, #tpu.memory_space<vmem>>, %arg6: memref<1x128xf32, #tpu.memory_space<vmem>>, %arg7: memref<16x128xf32, #tpu.memory_space<vmem>>, %arg8: memref<16x128xf32, #tpu.memory_space<vmem>>) attributes {dimension_semantics = [#tpu.dimension_semantics<parallel>, #tpu.dimension_semantics<arbitrary>], iteration_bounds = array<i64: 1, 1>, scalar_prefetch = 0 : i64, scratch_operands = 1 : i64, tpu.core_type = #tpu.core_type<tc>, window_params = [{transform_indices = @transform_0, window_bounds = array<i64: 16, 128>}, {transform_indices = @transform_1, window_bounds = array<i64: 128, 128>}, {transform_indices = @transform_2, window_bounds = array<i64: 1, 128>}, {transform_indices = @transform_3, window_bounds = array<i64: 128, 128>}, {pipeline_mode = #tpu.pipeline_mode<synchronous>, transform_indices = @transform_4, window_bounds = array<i64: 1, 128>}, {transform_indices = @transform_5, window_bounds = array<i64: 16, 128>}]} {
    %c0_i32 = arith.constant 0 : i32
    %0 = arith.cmpi eq, %arg1, %c0_i32 : i32
    %1 = arith.extui %0 : i1 to i32
    %c0_i32_0 = arith.constant 0 : i32
    %2 = arith.cmpi ne, %1, %c0_i32_0 : i32
    scf.if %2 {
      %cst_14 = arith.constant 0.000000e+00 : f32
      %20 = vector.broadcast %cst_14 : f32 to vector<16x128xf32>
      %c0_15 = arith.constant 0 : index
      %c0_16 = arith.constant 0 : index
      %21 = vector.load %arg8[%c0_15, %c0_16] : memref<16x128xf32, #tpu.memory_space<vmem>>, vector<16x128xf32>
      tpu.vector_store %arg8[%c0_15, %c0_16], %20 {strides = array<i32>} : memref<16x128xf32, #tpu.memory_space<vmem>>, vector<16x128xf32>,
    } else {
    }
    %c0 = arith.constant 0 : index
    %c0_1 = arith.constant 0 : index
    %3 = vector.load %arg2[%c0, %c0_1] : memref<16x128xbf16, #tpu.memory_space<vmem>>, vector<16x128xbf16>
    %c0_2 = arith.constant 0 : index
    %c0_3 = arith.constant 0 : index
    %4 = vector.load %arg3[%c0_2, %c0_3] : memref<128x128xbf16, #tpu.memory_space<vmem>>, vector<128x128xbf16>
    %cst = arith.constant dense<0.000000e+00> : vector<16x128xf32>
    %5 = tpu.matmul %3, %4, %cst {dimension_numbers = #tpu.dot_dimension_numbers<[1], [0], [0], [1], [0, 0, 1, 1], [], []>} : vector<16x128xbf16>, vector<128x128xbf16>, vector<16x128xf32> -> vector<16x128xf32>
    %c0_4 = arith.constant 0 : index
    %c0_5 = arith.constant 0 : index
    %6 = vector.load %arg4[%c0_4, %c0_5] : memref<1x128xf32, #tpu.memory_space<vmem>>, vector<1x128xf32>
    %7 = vector.broadcast %6 : vector<1x128xf32> to vector<16x128xf32>
    %8 = arith.addf %5, %7 : vector<16x128xf32>
    %cst_6 = arith.constant 0.000000e+00 : f32
    %9 = vector.broadcast %cst_6 : f32 to vector<16x128xf32>
    %10 = arith.maximumf %8, %9 : vector<16x128xf32>
    %11 = arith.truncf %10 : vector<16x128xf32> to vector<16x128xbf16>
    %c0_7 = arith.constant 0 : index
    %c0_8 = arith.constant 0 : index
    %12 = vector.load %arg5[%c0_7, %c0_8] : memref<128x128xbf16, #tpu.memory_space<vmem>>, vector<128x128xbf16>
    %cst_9 = arith.constant dense<0.000000e+00> : vector<16x128xf32>
    %13 = tpu.matmul %11, %12, %cst_9 {dimension_numbers = #tpu.dot_dimension_numbers<[1], [0], [0], [1], [0, 0, 1, 1], [], []>} : vector<16x128xbf16>, vector<128x128xbf16>, vector<16x128xf32> -> vector<16x128xf32>
    %c0_i32_10 = arith.constant 0 : i32
    %14 = arith.cmpi slt, %arg1, %c0_i32_10 : i32
    %15 = arith.extui %14 : i1 to i32
    %c0_i32_11 = arith.constant 0 : i32
    %16 = arith.cmpi ne, %15, %c0_i32_11 : i32
    scf.if %16 {
      %c0_14 = arith.constant 0 : index
      %c0_15 = arith.constant 0 : index
      %20 = vector.load %arg8[%c0_14, %c0_15] : memref<16x128xf32, #tpu.memory_space<vmem>>, vector<16x128xf32>
      %21 = arith.addf %20, %13 : vector<16x128xf32>
      %c0_16 = arith.constant 0 : index
      %c0_17 = arith.constant 0 : index
      %22 = vector.load %arg8[%c0_16, %c0_17] : memref<16x128xf32, #tpu.memory_space<vmem>>, vector<16x128xf32>
      tpu.vector_store %arg8[%c0_16, %c0_17], %21 {strides = array<i32>} : memref<16x128xf32, #tpu.memory_space<vmem>>, vector<16x128xf32>,
    } else {
    }
    %c0_i32_12 = arith.constant 0 : i32
    %17 = arith.cmpi eq, %arg1, %c0_i32_12 : i32
    %18 = arith.extui %17 : i1 to i32
    %c0_i32_13 = arith.constant 0 : i32
    %19 = arith.cmpi ne, %18, %c0_i32_13 : i32
    scf.if %19 {
      %c0_14 = arith.constant 0 : index
      %c0_15 = arith.constant 0 : index
      %20 = vector.load %arg8[%c0_14, %c0_15] : memref<16x128xf32, #tpu.memory_space<vmem>>, vector<16x128xf32>
      %21 = arith.addf %20, %13 : vector<16x128xf32>
      %c0_16 = arith.constant 0 : index
      %c0_17 = arith.constant 0 : index
      %22 = vector.load %arg6[%c0_16, %c0_17] : memref<1x128xf32, #tpu.memory_space<vmem>>, vector<1x128xf32>
      %23 = vector.broadcast %22 : vector<1x128xf32> to vector<16x128xf32>
      %24 = arith.addf %21, %23 : vector<16x128xf32>
      %c0_18 = arith.constant 0 : index
      %c0_19 = arith.constant 0 : index
      %25 = vector.load %arg7[%c0_18, %c0_19] : memref<16x128xf32, #tpu.memory_space<vmem>>, vector<16x128xf32>
      tpu.vector_store %arg7[%c0_18, %c0_19], %24 {strides = array<i32>} : memref<16x128xf32, #tpu.memory_space<vmem>>, vector<16x128xf32>,
    } else {
    }
    return
  }
  func.func @transform_0(%arg0: i32, %arg1: i32) -> (i32, i32) {
    %c0_i32 = arith.constant 0 : i32
    %c0_i32_0 = arith.constant 0 : i32
    return %arg0, %c0_i32 : i32, i32
  }
  func.func @transform_1(%arg0: i32, %arg1: i32) -> (i32, i32) {
    %c0_i32 = arith.constant 0 : i32
    %c0_i32_0 = arith.constant 0 : i32
    return %c0_i32, %arg1 : i32, i32
  }
  func.func @transform_2(%arg0: i32, %arg1: i32) -> (i32, i32) {
    %c0_i32 = arith.constant 0 : i32
    %c0_i32_0 = arith.constant 0 : i32
    return %c0_i32, %arg1 : i32, i32
  }
  func.func @transform_3(%arg0: i32, %arg1: i32) -> (i32, i32) {
    %c0_i32 = arith.constant 0 : i32
    %c0_i32_0 = arith.constant 0 : i32
    return %arg1, %c0_i32 : i32, i32
  }
  func.func @transform_4(%arg0: i32, %arg1: i32) -> (i32, i32) {
    %c0_i32 = arith.constant 0 : i32
    %c0_i32_0 = arith.constant 0 : i32
    %c0_i32_1 = arith.constant 0 : i32
    return %c0_i32, %c0_i32_0 : i32, i32
  }
  func.func @transform_5(%arg0: i32, %arg1: i32) -> (i32, i32) {
    %c0_i32 = arith.constant 0 : i32
    %c0_i32_0 = arith.constant 0 : i32
    return %arg0, %c0_i32 : i32, i32
  }
}

</mosaic_0001>

<bundles_post_ra>
// kernel: tpu_custom_call.1
= control target key start
LH: loop header
LB: loop body
LE: loop exit
PB: predicated region body
PF: predicated region fallthrough
CT: control target
= control target key end

     0   :  { %10 = vsyncpa [#allocation4], 0  ;;  %s543_s0 = inlined_call_operand.hbm [shape: bf16[16,128], index: 0, kind: input, shape index: {}]   ;;  %s544_s1 = inlined_call_operand.hbm [shape: bf16[128,128], index: 1, kind: input, shape index: {}]   ;;  %s545_s2 = inlined_call_operand.vmem [shape: f32[1,128], index: 2, kind: input, shape index: {}]   ;;  %s546_s3 = inlined_call_operand.hbm [shape: bf16[128,128], index: 3, kind: input, shape index: {}]   ;;  %s547_s4 = inlined_call_operand.vmem [shape: f32[1,128], index: 4, kind: input, shape index: {}]   ;;  %s548_s5 = inlined_call_operand.hbm [shape: f32[16,128], index: 5, kind: output, shape index: {}]  }
   0x1   :  { %11 = vsyncpa [#allocation7], 0 }
   0x2   :  { %12 = vsyncpa [#allocation5], 0  ;;  %s30_s20 = sshll.u32 %s544_s1, 4  ;;  %s487_s21 = smov [#allocation6]   ;;  %s31_s20 = int_to_ptr.hbm [resolvable:$true] %s30_s20 }
   0x3   :  { %s32_s22 = sshll.u32 %s487_s21, 4  ;;  %s17_s25 = sshll.u32 %s543_s0, 4  ;;  %s33_s22 = int_to_ptr.vmem [resolvable:$true] %s32_s22  ;;  %s18_s25 = int_to_ptr.hbm [resolvable:$true] %s17_s25 }
   0x4   :  { %s488_s26 = smov 64   ;;  %s489_s27 = smov 4  }
   0x5   :  { %38 = dma.hbm_to_vmem [thread:$0]  %s31_s20, 1024, %s33_s22, [#allocation7], %s488_s26, %s488_s26, %s489_s27  }
   0x6   :  { %s490_s28 = smov [#allocation3]   ;;  %s45_s7 = sshll.u32 %s546_s3, 4  ;;  %s46_s7 = int_to_ptr.hbm [resolvable:$true] %s45_s7 }
   0x7   :  { %s19_s29 = sshll.u32 %s490_s28, 4  ;;  %s491_s1 = smov [#allocation8]   ;;  %s20_s29 = int_to_ptr.vmem [resolvable:$true] %s19_s29 }
   0x8   :  { %25 = dma.hbm_to_vmem [thread:$0]  %s18_s25, 128, %s20_s29, [#allocation4], %s488_s26, %s488_s26, %s489_s27  }
   0x9   :  { %s47_s8 = sshll.u32 %s491_s1, 4  ;;  %s48_s8 = int_to_ptr.vmem [resolvable:$true] %s47_s8 }
   0xa   :  { %53 = dma.hbm_to_vmem [thread:$0]  %s46_s7, 1024, %s48_s8, [#allocation7], %s488_s26, %s488_s26, %s489_s27  }
   0xb   :  { %481 = dma.done.wait [#allocation4], 128  }
   0xc   :  { %482 = vsyncadd [#allocation4], 4294967168 }
   0xd   :  { %483 = dma.done.wait [#allocation7], 2048  }
   0xe   :  { %484 = vsyncadd [#allocation7], 4294965248  ;;  %v366_v0 = vld [vmem:[#allocation6 + $0x38] sm:$0xff]  ;;  %v365_v1 = vld [vmem:[#allocation6 + $0x30] sm:$0xff]  ;;  %s492_s11 = smov [#allocation9]   ;;  %s493_s15 = smov 128  }
   0xf   :  { %150 = vmatpush.bf16.msra.mxu0 %v366_v0  ;;  %v374_v2 = vld [vmem:[#allocation8 + $0x38] sm:$0xff]  ;;  %v373_v3 = vld [vmem:[#allocation8 + $0x30] sm:$0xff]  ;;  %v364_v4 = vld [vmem:[#allocation6 + $0x28] sm:$0xff]  ;;  %s274_s12 = sshll.u32 %s492_s11, 4  ;;  %s494_s16 = smov 8   ;;  %s275_s12 = int_to_ptr.vmem [resolvable:$true] %s274_s12 }
  0x10   :  { %231 = vmatpush.bf16.msra.mxu1 %v374_v2  ;;  %v372_v5 = vld [vmem:[#allocation8 + $0x28] sm:$0xff]  ;;  %v363_v6 = vld [vmem:[#allocation6 + $0x20] sm:$0xff]  ;;  %v362_v8 = vld [vmem:[#allocation6 + $0x18] sm:$0xff] }
  0x11   :  { %v371_v7 = vld [vmem:[#allocation8 + $0x20] sm:$0xff]  ;;  %v361_v9 = vld [vmem:[#allocation6 + $0x10] sm:$0xff]  ;;  %v360_v10 = vld [vmem:[#allocation6 + $0x8] sm:$0xff] }
  0x12   :  { %v359_v11 = vld [vmem:[#allocation6] sm:$0xff]  ;;  %v358_v12 = vld [vmem:[#allocation3] sm:$0xff]  ;;  %v369_v14 = vld [vmem:[#allocation8 + $0x10] sm:$0xff] }
  0x13   :  { %151 = vmatpush.bf16.msra.mxu0 %v365_v1  ;;  %v370_v13 = vld [vmem:[#allocation8 + $0x18] sm:$0xff]  ;;  %v368_v15 = vld [vmem:[#allocation8 + $0x8] sm:$0xff]  ;;  %v367_v16 = vld [vmem:[#allocation8] sm:$0xff] }
  0x14   :  { %232 = vmatpush.bf16.msra.mxu1 %v373_v3  ;;  %v383_v18 = vld [vmem:[%s545_s2] ss:$0 sm:$0xff]  ;;  %s276_s2 = sshll.u32 %s548_s5, 4  ;;  %s277_s2 = int_to_ptr.hbm [resolvable:$true] %s276_s2 }
  0x15   :  { %v384_v25 = vld [vmem:[%s547_s4] ss:$0 sm:$0xff] }
  0x17   :  { %152 = vmatpush.bf16.msra.mxu0 %v364_v4 }
  0x18   :  { %233 = vmatpush.bf16.msra.mxu1 %v372_v5 }
  0x1b   :  { %153 = vmatpush.bf16.msra.mxu0 %v363_v6 }
  0x1c   :  { %234 = vmatpush.bf16.msra.mxu1 %v371_v7 }
  0x1f   :  { %154 = vmatpush.bf16.msra.mxu0 %v362_v8 }
  0x20   :  { %235 = vmatpush.bf16.msra.mxu1 %v370_v13 }
  0x23   :  { %155 = vmatpush.bf16.msra.mxu0 %v361_v9 }
  0x24   :  { %236 = vmatpush.bf16.msra.mxu1 %v369_v14 }
  0x27   :  { %156 = vmatpush.bf16.msra.mxu0 %v360_v10 }
  0x28   :  { %237 = vmatpush.bf16.msra.mxu1 %v368_v15 }
  0x2b   :  { %157 = vmatpush.bf16.msra.mxu0 %v359_v11 }
  0x2c   :  { %238 = vmatpush.bf16.msra.mxu1 %v367_v16 }
  0x2e   :  { %158 = vmatmul.bf16.vlgmr.msra.gmra.mxu0 %v358_v12 }
  0xab   :  { %v159_v17 = vpop.f32.mrf.mxu0 }
  0xac   :  { %v160_v19 = vadd.f32 %v383_v18, %v159_v17 }
  0xae   :  { %v164_v22 = vmax.f32 %v160_v19, 0.0 }
  0xb3   :  { %v161_v20 = vpop.f32.mrf.mxu0 }
  0xb4   :  { %v162_v21 = vadd.f32 %v383_v18, %v161_v20 }
  0xb6   :  { %v165_v23 = vmax.f32 %v162_v21, 0.0 }
  0xb8   :  { %v166_v24 = vpack.c.bf16 %v165_v23, %v164_v22 }
  0xba   :  { %239 = vmatmul.bf16.vlgmr.msra.gmra.mxu1 %v166_v24 }
 0x137   :  { %v240_v26 = vpop.f32.mrf.mxu1 }
 0x138   :  { %v266_v27 = vadd.f32 %v384_v25, %v240_v26 }
 0x13a   :  { %268 = vst [vmem:[#allocation9] sm:$0xff] %v266_v27 }
 0x13f   :  { %v242_v28 = vpop.f32.mrf.mxu1 }
 0x140   :  { %v267_v29 = vadd.f32 %v384_v25, %v242_v28 }
 0x142   :  { %269 = vst [vmem:[#allocation9 + $0x8] sm:$0xff] %v267_v29 }
 0x143   :  { %282 = dma.vmem_to_hbm [thread:$0]  %s275_s12, 256, %s277_s2, [#allocation5], %s493_s15, %s493_s15, %s494_s16  }
 0x144   :  { %485 = dma.done.wait [#allocation5], 256  }
 0x145   :  { %486 = vsyncadd [#allocation5], 4294967040 }
 0x146   :  { %287 = vsyncpa [#allocation4], 1 }
 0x147   :  { %288 = vsyncpa [#allocation7], 1 }
 0x148   :  { %289 = vsyncpa [#allocation5], 1 }

</bundles_post_ra>
